<compile_context>
chip_gen: v7x
topology: tpu7x:2x2x1
jax: 0.10.0
libtpu: 0.0.40
codegen_flags: <defaults>
</compile_context>

<pallas_src>
import jax
import jax.numpy as jnp
import numpy as np
from jax.experimental import pallas as pl
from jax.experimental.pallas import tpu as pltpu


# ----------------------------------------------------------------------------
# shape helpers
# ----------------------------------------------------------------------------
def _shapes(H, W):
    H1, W1 = H - 1, W - 1          # after conv1 (2x2, stride 1, valid)
    Hp, Wp = H1 // 2, W1 // 2      # after maxpool 2x2 stride 2 (floor)
    H2, W2 = Hp - 1, Wp - 1        # after conv2
    H3, W3 = H2 - 1, W2 - 1        # after conv3
    return H1, W1, Hp, Wp, H2, W2, H3, W3


def _round_up(x, m):
    return ((x + m - 1) // m) * m


# ----------------------------------------------------------------------------
# wrapper-side parameter packing (pure layout plumbing)
# ----------------------------------------------------------------------------
def _banded_conv(wconv, w_in, w_out):
    """PyTorch conv weight (Cout, Cin, 2, 2) -> (2, w_in*Cin, w_out*Cout).

    m[di] maps a row's (w, ci)-flattened lane vector to the (j, co)-flattened
    conv output of that row pair: m[di][(j+dj)*Cin+ci, j*Cout+co] = w[co,ci,di,dj].
    """
    w_np = np.asarray(wconv, np.float32)
    cout, cin = w_np.shape[0], w_np.shape[1]
    m = np.zeros((2, w_in * cin, w_out * cout), np.float32)
    for di in range(2):
        for dj in range(2):
            blk = w_np[:, :, di, dj].T                       # (Cin, Cout)
            for j in range(w_out):
                m[di, (j + dj) * cin:(j + dj + 1) * cin,
                  j * cout:(j + 1) * cout] = blk
    return m


def _tile_bias(b, reps):
    return np.tile(np.asarray(b, np.float32), reps)[None, :]   # (1, reps*Cout)


def pack_operands(params, H, W, no_skills, n_out_pad):
    H1, W1, Hp, Wp, H2, W2, H3, W3 = _shapes(H, W)
    bf16, f32 = jnp.bfloat16, jnp.float32

    # conv1: banded matrix, di bands stacked along K, output columns split into
    # even-w / odd-w halves so the width half of the maxpool is a plain VPU max.
    m1 = _banded_conv(params["w1"], W, W1).reshape(2, W * 3, W1, 16)
    m1e = m1[:, :, 0:2 * Wp:2, :].reshape(2 * W * 3, Wp * 16)
    m1o = m1[:, :, 1:2 * Wp:2, :].reshape(2 * W * 3, Wp * 16)

    # conv2 / conv3: banded matrices with the two di bands stacked along K.
    m2 = _banded_conv(params["w2"], Wp, W2).reshape(2 * Wp * 16, W2 * 32)
    m3 = _banded_conv(params["w3"], W2, W3).reshape(2 * W2 * 32, W3 * 64)

    b1 = _tile_bias(params["b1"], Wp)     # conv1 bias added AFTER pooling
    b2 = _tile_bias(params["b2"], W2)
    b3 = _tile_bias(params["b3"], W3)

    # Linear1: permute columns from PyTorch CHW flatten order to our (h, w, c)
    # order and split per conv3 output row h (each block pairs with one
    # aligned TB-row slab of conv3 output).
    wl1 = np.asarray(params["wl1"], np.float32)              # (64, embed) CHW
    wl1 = wl1.reshape(64, 64, H3, W3).transpose(2, 3, 1, 0).reshape(
        H3, W3 * 64, 64)

    # Linear2: transpose + zero-pad output lanes to n_out_pad (dense store).
    wl2 = np.asarray(params["wl2"], np.float32).T            # (64, no_skills)
    wl2_p = np.zeros((64, n_out_pad), np.float32)
    wl2_p[:, :no_skills] = wl2
    bl2_p = np.zeros((1, n_out_pad), np.float32)
    bl2_p[0, :no_skills] = np.asarray(params["bl2"], np.float32)

    return dict(
        m1e=jnp.asarray(m1e, bf16), m1o=jnp.asarray(m1o, bf16),
        b1=jnp.asarray(b1, f32),
        m2=jnp.asarray(m2, bf16), b2=jnp.asarray(b2, f32),
        m3=jnp.asarray(m3, bf16), b3=jnp.asarray(b3, f32),
        wl1=jnp.asarray(wl1, bf16),
        bl1=jnp.asarray(np.asarray(params["bl1"], np.float32)[None, :], f32),
        wl2=jnp.asarray(wl2_p, bf16), bl2=jnp.asarray(bl2_p, f32))


# ----------------------------------------------------------------------------
# the kernel
# ----------------------------------------------------------------------------
def _make_kernel(TB, H, W):
    H1, W1, Hp, Wp, H2, W2, H3, W3 = _shapes(H, W)
    f32, bf16 = jnp.float32, jnp.bfloat16

    def kernel(x_ref, m1e_ref, m1o_ref, b1_ref, m2_ref, b2_ref,
               m3_ref, b3_ref, wl1_ref, bl1_ref, wl2_ref, bl2_ref, out_ref):
        x = x_ref[...]                                       # (H*TB, W*3) bf16

        # ---- conv1 (both 2x2 kernel rows fused along K), even/odd columns ---
        xb = jnp.concatenate([x[0:H1 * TB, :], x[TB:H * TB, :]], axis=1)
        a1e = jnp.dot(xb, m1e_ref[...], preferred_element_type=f32)
        a1o = jnp.dot(xb, m1o_ref[...], preferred_element_type=f32)

        # ---- MaxPool 2x2/2: width half = max(even, odd); height half = max
        # of aligned TB-row block pairs.  Bias + ReLU commute with max. -------
        cmax = jnp.maximum(a1e, a1o)                         # (H1*TB, Wp*16)
        rmax = jnp.concatenate(
            [jnp.maximum(cmax[(2 * p) * TB:(2 * p + 1) * TB, :],
                         cmax[(2 * p + 1) * TB:(2 * p + 2) * TB, :])
             for p in range(Hp)], axis=0)                    # (Hp*TB, Wp*16)
        pool = jnp.maximum(rmax + b1_ref[...], 0.0).astype(bf16)

        # ---- conv2 + bias + ReLU --------------------------------------------
        xb2 = jnp.concatenate([pool[0:H2 * TB, :], pool[TB:Hp * TB, :]], axis=1)
        a2 = jnp.dot(xb2, m2_ref[...], preferred_element_type=f32)
        a2 = jnp.maximum(a2 + b2_ref[...], 0.0).astype(bf16)   # (H2*TB, W2*32)

        # ---- conv3 + bias + ReLU --------------------------------------------
        xb3 = jnp.concatenate([a2[0:H3 * TB, :], a2[TB:H2 * TB, :]], axis=1)
        a3 = jnp.dot(xb3, m3_ref[...], preferred_element_type=f32)
        a3 = jnp.maximum(a3 + b3_ref[...], 0.0).astype(bf16)   # (H3*TB, W3*64)

        # ---- flatten (aligned per-row-block slices; CHW folded into wl1) ----
        acc = jnp.dot(a3[0:TB, :], wl1_ref[0], preferred_element_type=f32)
        for i in range(1, H3):
            acc = acc + jnp.dot(a3[i * TB:(i + 1) * TB, :], wl1_ref[i],
                                preferred_element_type=f32)

        # ---- discriminator MLP head (output lanes padded for dense store) ---
        h = jnp.tanh(acc + bl1_ref[...]).astype(bf16)        # (TB, 64)
        out_ref[...] = (jnp.dot(h, wl2_ref[...], preferred_element_type=f32)
                        + bl2_ref[...])

    return kernel


# ----------------------------------------------------------------------------
# per-tile VMEM footprint estimate (for vmem_limit_bytes)
# ----------------------------------------------------------------------------
def _vmem_estimate(TB, H, W, n_out_pad):
    H1, W1, Hp, Wp, H2, W2, H3, W3 = _shapes(H, W)
    bf, f4 = 2, 4
    est = 0
    est += 2 * H * TB * W * 3 * bf                  # x block (double buffered)
    est += 2 * TB * n_out_pad * f4                  # out block (double buffered)
    est += H1 * TB * (2 * W * 3) * bf               # xb
    est += H1 * TB * Wp * 16 * 3 * f4               # a1e / a1o / cmax
    est += Hp * TB * Wp * 16 * (f4 + bf)            # rmax / pool
    est += H2 * TB * (2 * Wp * 16) * bf             # xb2
    est += H2 * TB * W2 * 32 * (f4 + bf)            # a2
    est += H3 * TB * (2 * W2 * 32) * bf             # xb3
    est += H3 * TB * W3 * 64 * (f4 + bf)            # a3
    est += TB * (64 * (f4 + bf) + n_out_pad * f4)   # head
    est += 2 * (2 * (2 * W * 3 * Wp * 16) + 2 * Wp * 16 * W2 * 32
                + 2 * W2 * 32 * W3 * 64 + H3 * W3 * 64 * 64
                + 64 * n_out_pad) * bf              # resident weights (x2 bufs)
    return est


# ----------------------------------------------------------------------------
# wrapper
# ----------------------------------------------------------------------------
def diayn_discriminator_forward(image_nhwc, params, no_skills, batch_tile=128):
    """image_nhwc: (B, H, W, 3) observation; returns (B, no_skills) logits."""
    B, H, W, C = image_nhwc.shape
    assert C == 3, "expects 3-channel observation image"
    H1, W1, Hp, Wp, H2, W2, H3, W3 = _shapes(H, W)
    assert H3 >= 1 and W3 >= 1, "observation too small for this conv stack"

    # Batch tile: multiple of 16 (bf16 sublane tile), clamped for tiny batches.
    TB = max(16, (min(batch_tile, _round_up(B, 16)) // 16) * 16)
    B_pad = _round_up(B, TB)
    G = B_pad // TB
    n_out_pad = _round_up(max(no_skills, 1), 128)

    img = image_nhwc.astype(jnp.float32)
    if B_pad != B:
        img = jnp.concatenate(
            [img, jnp.zeros((B_pad - B, H, W, C), jnp.float32)], axis=0)
    # h-major slab per batch tile: row = h*TB + b, lanes = (w, channel).
    x2d = (img.reshape(G, TB, H, W * C)
              .transpose(0, 2, 1, 3)
              .reshape(G * H * TB, W * C)
              .astype(jnp.bfloat16))

    ops = pack_operands(params, H, W, no_skills, n_out_pad)
    args = (x2d, ops["m1e"], ops["m1o"], ops["b1"], ops["m2"], ops["b2"],
            ops["m3"], ops["b3"], ops["wl1"], ops["bl1"], ops["wl2"],
            ops["bl2"])

    def _const_spec(a):
        return pl.BlockSpec(a.shape, lambda g, n=a.ndim: (0,) * n)

    in_specs = ([pl.BlockSpec((H * TB, W * C), lambda g: (g, 0))]
                + [_const_spec(a) for a in args[1:]])
    out_specs = pl.BlockSpec((TB, n_out_pad), lambda g: (g, 0))

    vmem_limit = int(min(48 * 2**20,
                         max(16 * 2**20,
                             4 * _vmem_estimate(TB, H, W, n_out_pad))))

    out = pl.pallas_call(
        _make_kernel(TB, H, W),
        out_shape=jax.ShapeDtypeStruct((B_pad, n_out_pad), jnp.float32),
        grid=(G,),
        in_specs=in_specs,
        out_specs=out_specs,
        compiler_params=pltpu.CompilerParams(
            dimension_semantics=("parallel",),
            vmem_limit_bytes=vmem_limit),
    )(*args)
    return out[:B, :no_skills]


# ----------------------------------------------------------------------------
# deterministic synthetic parameters (PyTorch layouts, init_params for Linear)
# ----------------------------------------------------------------------------
def make_params(key, H, W, no_skills):
    *_, H3, W3 = _shapes(H, W)
    embed = H3 * W3 * 64
    ks = jax.random.split(key, 8)

    def conv_w(k, cout, cin):
        bound = 1.0 / float(np.sqrt(cin * 4))
        return jax.random.uniform(k, (cout, cin, 2, 2), jnp.float32, -bound, bound)

    def conv_b(k, cout, cin):
        bound = 1.0 / float(np.sqrt(cin * 4))
        return jax.random.uniform(k, (cout,), jnp.float32, -bound, bound)

    w1, b1 = conv_w(ks[0], 16, 3), conv_b(ks[1], 16, 3)
    w2, b2 = conv_w(ks[2], 32, 16), conv_b(ks[3], 32, 16)
    w3, b3 = conv_w(ks[4], 64, 32), conv_b(ks[5], 64, 32)

    def init_linear(k, out_dim, in_dim):   # normal(0,1), row-normalized, bias 0
        w = jax.random.normal(k, (out_dim, in_dim), jnp.float32)
        w = w / jnp.sqrt(jnp.sum(w * w, axis=1, keepdims=True))
        return w, jnp.zeros((out_dim,), jnp.float32)

    wl1, bl1 = init_linear(ks[6], 64, embed)
    wl2, bl2 = init_linear(ks[7], no_skills, 64)
    return dict(w1=w1, b1=b1, w2=w2, b2=b2, w3=w3, b3=b3,
                wl1=wl1, bl1=bl1, wl2=wl2, bl2=bl2)


# ----------------------------------------------------------------------------
# float64 numpy reference (matches the PyTorch forward exactly)
# ----------------------------------------------------------------------------
def _conv2x2_np(x, w, b):
    Bn, Hn, Wn, Cin = x.shape
    Ho, Wo = Hn - 1, Wn - 1
    y = np.zeros((Bn, Ho, Wo, w.shape[0]), np.float64)
    for di in range(2):
        for dj in range(2):
            patch = x[:, di:di + Ho, dj:dj + Wo, :]
            y += np.einsum("bhwc,oc->bhwo", patch, w[:, :, di, dj])
    return y + b[None, None, None, :]


def reference_forward(image_nhwc, params):
    f = lambda a: np.asarray(a, np.float64)
    x = f(image_nhwc)
    x = np.maximum(_conv2x2_np(x, f(params["w1"]), f(params["b1"])), 0.0)
    Bn, H1n, W1n, Cn = x.shape
    Hp, Wp = H1n // 2, W1n // 2
    x = x[:, :2 * Hp, :2 * Wp, :].reshape(Bn, Hp, 2, Wp, 2, Cn).max(axis=(2, 4))
    x = np.maximum(_conv2x2_np(x, f(params["w2"]), f(params["b2"])), 0.0)
    x = np.maximum(_conv2x2_np(x, f(params["w3"]), f(params["b3"])), 0.0)
    emb = np.transpose(x, (0, 3, 1, 2)).reshape(Bn, -1)       # CHW flatten
    h = np.tanh(emb @ f(params["wl1"]).T + f(params["bl1"]))
    return h @ f(params["wl2"]).T + f(params["bl2"])


if __name__ == "__main__":
    root = jax.random.PRNGKey(0)

    def check(kimg, kpar, B, H, W, no_skills, batch_tile):
        image = jax.random.uniform(kimg, (B, H, W, 3), dtype=jnp.float32)
        params = make_params(kpar, H, W, no_skills)
        out = diayn_discriminator_forward(image, params, no_skills,
                                          batch_tile=batch_tile)
        out = jax.block_until_ready(out)
        assert out.shape == (B, no_skills) and out.dtype == jnp.float32
        ref = reference_forward(np.asarray(image), params)
        err = float(np.max(np.abs(np.asarray(out, np.float64) - ref)))
        assert np.isfinite(err) and err < 5e-2, f"mismatch vs reference: {err}"

    k = jax.random.split(root, 4)
    # minigrid-style 7x7x3 obs (image_embedding_size = 64), tiny batch.
    check(k[0], k[1], 2, 7, 7, 8, 128)
    # larger rectangular obs, multi-step grid with batch padding (24 -> 2 tiles).
    check(k[2], k[3], 24, 10, 9, 8, 16)
    print("KERNEL_OK")
</pallas_src>

<mosaic_0001>
module attributes {stable_mosaic.version = 11 : i64} {
  func.func @kernel(%arg0: i32, %arg1: memref<112x21xbf16, #tpu.memory_space<vmem>>, %arg2: memref<42x48xbf16, #tpu.memory_space<vmem>>, %arg3: memref<42x48xbf16, #tpu.memory_space<vmem>>, %arg4: memref<1x48xf32, #tpu.memory_space<vmem>>, %arg5: memref<96x64xbf16, #tpu.memory_space<vmem>>, %arg6: memref<1x64xf32, #tpu.memory_space<vmem>>, %arg7: memref<128x64xbf16, #tpu.memory_space<vmem>>, %arg8: memref<1x64xf32, #tpu.memory_space<vmem>>, %arg9: memref<1x64x64xbf16, #tpu.memory_space<vmem>>, %arg10: memref<1x64xf32, #tpu.memory_space<vmem>>, %arg11: memref<64x128xbf16, #tpu.memory_space<vmem>>, %arg12: memref<1x128xf32, #tpu.memory_space<vmem>>, %arg13: memref<16x128xf32, #tpu.memory_space<vmem>>) attributes {dimension_semantics = [#tpu.dimension_semantics<parallel>], iteration_bounds = array<i64: 1>, scalar_prefetch = 0 : i64, scratch_operands = 0 : i64, tpu.core_type = #tpu.core_type<tc>, window_params = [{transform_indices = @transform_0, window_bounds = array<i64: 112, 21>}, {pipeline_mode = #tpu.pipeline_mode<synchronous>, transform_indices = @transform_1, window_bounds = array<i64: 42, 48>}, {pipeline_mode = #tpu.pipeline_mode<synchronous>, transform_indices = @transform_2, window_bounds = array<i64: 42, 48>}, {pipeline_mode = #tpu.pipeline_mode<synchronous>, transform_indices = @transform_3, window_bounds = array<i64: 1, 48>}, {pipeline_mode = #tpu.pipeline_mode<synchronous>, transform_indices = @transform_4, window_bounds = array<i64: 96, 64>}, {pipeline_mode = #tpu.pipeline_mode<synchronous>, transform_indices = @transform_5, window_bounds = array<i64: 1, 64>}, {pipeline_mode = #tpu.pipeline_mode<synchronous>, transform_indices = @transform_6, window_bounds = array<i64: 128, 64>}, {pipeline_mode = #tpu.pipeline_mode<synchronous>, transform_indices = @transform_7, window_bounds = array<i64: 1, 64>}, {pipeline_mode = #tpu.pipeline_mode<synchronous>, transform_indices = @transform_8, window_bounds = array<i64: 1, 64, 64>}, {pipeline_mode = #tpu.pipeline_mode<synchronous>, transform_indices = @transform_9, window_bounds = array<i64: 1, 64>}, {pipeline_mode = #tpu.pipeline_mode<synchronous>, transform_indices = @transform_10, window_bounds = array<i64: 64, 128>}, {pipeline_mode = #tpu.pipeline_mode<synchronous>, transform_indices = @transform_11, window_bounds = array<i64: 1, 128>}, {transform_indices = @transform_12, window_bounds = array<i64: 16, 128>}]} {
    %c0 = arith.constant 0 : index
    %c0_0 = arith.constant 0 : index
    %0 = vector.load %arg1[%c0, %c0_0] : memref<112x21xbf16, #tpu.memory_space<vmem>>, vector<112x21xbf16>
    %1 = vector.extract_strided_slice %0 {offsets = [0, 0], sizes = [96, 21], strides = [1, 1]} : vector<112x21xbf16> to vector<96x21xbf16>
    %2 = vector.extract_strided_slice %0 {offsets = [16, 0], sizes = [96, 21], strides = [1, 1]} : vector<112x21xbf16> to vector<96x21xbf16>
    %3 = tpu.concatenate %1, %2 in 1 : vector<96x21xbf16>, vector<96x21xbf16> -> vector<96x42xbf16>
    %c0_1 = arith.constant 0 : index
    %c0_2 = arith.constant 0 : index
    %4 = vector.load %arg2[%c0_1, %c0_2] : memref<42x48xbf16, #tpu.memory_space<vmem>>, vector<42x48xbf16>
    %cst = arith.constant dense<0.000000e+00> : vector<96x48xf32>
    %5 = tpu.matmul %3, %4, %cst {dimension_numbers = #tpu.dot_dimension_numbers<[1], [0], [0], [1], [0, 0, 1, 1], [], []>} : vector<96x42xbf16>, vector<42x48xbf16>, vector<96x48xf32> -> vector<96x48xf32>
    %c0_3 = arith.constant 0 : index
    %c0_4 = arith.constant 0 : index
    %6 = vector.load %arg3[%c0_3, %c0_4] : memref<42x48xbf16, #tpu.memory_space<vmem>>, vector<42x48xbf16>
    %cst_5 = arith.constant dense<0.000000e+00> : vector<96x48xf32>
    %7 = tpu.matmul %3, %6, %cst_5 {dimension_numbers = #tpu.dot_dimension_numbers<[1], [0], [0], [1], [0, 0, 1, 1], [], []>} : vector<96x42xbf16>, vector<42x48xbf16>, vector<96x48xf32> -> vector<96x48xf32>
    %8 = arith.maximumf %5, %7 : vector<96x48xf32>
    %9 = vector.extract_strided_slice %8 {offsets = [0, 0], sizes = [16, 48], strides = [1, 1]} : vector<96x48xf32> to vector<16x48xf32>
    %10 = vector.extract_strided_slice %8 {offsets = [16, 0], sizes = [16, 48], strides = [1, 1]} : vector<96x48xf32> to vector<16x48xf32>
    %11 = arith.maximumf %9, %10 : vector<16x48xf32>
    %12 = vector.extract_strided_slice %8 {offsets = [32, 0], sizes = [16, 48], strides = [1, 1]} : vector<96x48xf32> to vector<16x48xf32>
    %13 = vector.extract_strided_slice %8 {offsets = [48, 0], sizes = [16, 48], strides = [1, 1]} : vector<96x48xf32> to vector<16x48xf32>
    %14 = arith.maximumf %12, %13 : vector<16x48xf32>
    %15 = vector.extract_strided_slice %8 {offsets = [64, 0], sizes = [16, 48], strides = [1, 1]} : vector<96x48xf32> to vector<16x48xf32>
    %16 = vector.extract_strided_slice %8 {offsets = [80, 0], sizes = [16, 48], strides = [1, 1]} : vector<96x48xf32> to vector<16x48xf32>
    %17 = arith.maximumf %15, %16 : vector<16x48xf32>
    %18 = tpu.concatenate %11, %14, %17 in 0 : vector<16x48xf32>, vector<16x48xf32>, vector<16x48xf32> -> vector<48x48xf32>
    %c0_6 = arith.constant 0 : index
    %c0_7 = arith.constant 0 : index
    %19 = vector.load %arg4[%c0_6, %c0_7] : memref<1x48xf32, #tpu.memory_space<vmem>>, vector<1x48xf32>
    %20 = vector.broadcast %19 : vector<1x48xf32> to vector<48x48xf32>
    %21 = arith.addf %18, %20 : vector<48x48xf32>
    %cst_8 = arith.constant 0.000000e+00 : f32
    %22 = vector.broadcast %cst_8 : f32 to vector<48x48xf32>
    %23 = arith.maximumf %21, %22 : vector<48x48xf32>
    %24 = arith.truncf %23 : vector<48x48xf32> to vector<48x48xbf16>
    %25 = vector.extract_strided_slice %24 {offsets = [0, 0], sizes = [32, 48], strides = [1, 1]} : vector<48x48xbf16> to vector<32x48xbf16>
    %26 = vector.extract_strided_slice %24 {offsets = [16, 0], sizes = [32, 48], strides = [1, 1]} : vector<48x48xbf16> to vector<32x48xbf16>
    %27 = tpu.concatenate %25, %26 in 1 : vector<32x48xbf16>, vector<32x48xbf16> -> vector<32x96xbf16>
    %c0_9 = arith.constant 0 : index
    %c0_10 = arith.constant 0 : index
    %28 = vector.load %arg5[%c0_9, %c0_10] : memref<96x64xbf16, #tpu.memory_space<vmem>>, vector<96x64xbf16>
    %cst_11 = arith.constant dense<0.000000e+00> : vector<32x64xf32>
    %29 = tpu.matmul %27, %28, %cst_11 {dimension_numbers = #tpu.dot_dimension_numbers<[1], [0], [0], [1], [0, 0, 1, 1], [], []>} : vector<32x96xbf16>, vector<96x64xbf16>, vector<32x64xf32> -> vector<32x64xf32>
    %c0_12 = arith.constant 0 : index
    %c0_13 = arith.constant 0 : index
    %30 = vector.load %arg6[%c0_12, %c0_13] : memref<1x64xf32, #tpu.memory_space<vmem>>, vector<1x64xf32>
    %31 = vector.broadcast %30 : vector<1x64xf32> to vector<32x64xf32>
    %32 = arith.addf %29, %31 : vector<32x64xf32>
    %cst_14 = arith.constant 0.000000e+00 : f32
    %33 = vector.broadcast %cst_14 : f32 to vector<32x64xf32>
    %34 = arith.maximumf %32, %33 : vector<32x64xf32>
    %35 = arith.truncf %34 : vector<32x64xf32> to vector<32x64xbf16>
    %36 = vector.extract_strided_slice %35 {offsets = [0, 0], sizes = [16, 64], strides = [1, 1]} : vector<32x64xbf16> to vector<16x64xbf16>
    %37 = vector.extract_strided_slice %35 {offsets = [16, 0], sizes = [16, 64], strides = [1, 1]} : vector<32x64xbf16> to vector<16x64xbf16>
    %38 = tpu.concatenate %36, %37 in 1 : vector<16x64xbf16>, vector<16x64xbf16> -> vector<16x128xbf16>
    %c0_15 = arith.constant 0 : index
    %c0_16 = arith.constant 0 : index
    %39 = vector.load %arg7[%c0_15, %c0_16] : memref<128x64xbf16, #tpu.memory_space<vmem>>, vector<128x64xbf16>
    %cst_17 = arith.constant dense<0.000000e+00> : vector<16x64xf32>
    %40 = tpu.matmul %38, %39, %cst_17 {dimension_numbers = #tpu.dot_dimension_numbers<[1], [0], [0], [1], [0, 0, 1, 1], [], []>} : vector<16x128xbf16>, vector<128x64xbf16>, vector<16x64xf32> -> vector<16x64xf32>
    %c0_18 = arith.constant 0 : index
    %c0_19 = arith.constant 0 : index
    %41 = vector.load %arg8[%c0_18, %c0_19] : memref<1x64xf32, #tpu.memory_space<vmem>>, vector<1x64xf32>
    %42 = vector.broadcast %41 : vector<1x64xf32> to vector<16x64xf32>
    %43 = arith.addf %40, %42 : vector<16x64xf32>
    %cst_20 = arith.constant 0.000000e+00 : f32
    %44 = vector.broadcast %cst_20 : f32 to vector<16x64xf32>
    %45 = arith.maximumf %43, %44 : vector<16x64xf32>
    %46 = arith.truncf %45 : vector<16x64xf32> to vector<16x64xbf16>
    %c0_21 = arith.constant 0 : index
    %c0_22 = arith.constant 0 : index
    %c0_23 = arith.constant 0 : index
    %47 = vector.load %arg9[%c0_21, %c0_22, %c0_23] : memref<1x64x64xbf16, #tpu.memory_space<vmem>>, vector<1x64x64xbf16>
    %48 = vector.shape_cast %47 : vector<1x64x64xbf16> to vector<64x64xbf16>
    %cst_24 = arith.constant dense<0.000000e+00> : vector<16x64xf32>
    %49 = tpu.matmul %46, %48, %cst_24 {dimension_numbers = #tpu.dot_dimension_numbers<[1], [0], [0], [1], [0, 0, 1, 1], [], []>} : vector<16x64xbf16>, vector<64x64xbf16>, vector<16x64xf32> -> vector<16x64xf32>
    %c0_25 = arith.constant 0 : index
    %c0_26 = arith.constant 0 : index
    %50 = vector.load %arg10[%c0_25, %c0_26] : memref<1x64xf32, #tpu.memory_space<vmem>>, vector<1x64xf32>
    %51 = vector.broadcast %50 : vector<1x64xf32> to vector<16x64xf32>
    %52 = arith.addf %49, %51 : vector<16x64xf32>
    %53 = math.tanh %52 : vector<16x64xf32>
    %54 = arith.truncf %53 : vector<16x64xf32> to vector<16x64xbf16>
    %c0_27 = arith.constant 0 : index
    %c0_28 = arith.constant 0 : index
    %55 = vector.load %arg11[%c0_27, %c0_28] : memref<64x128xbf16, #tpu.memory_space<vmem>>, vector<64x128xbf16>
    %cst_29 = arith.constant dense<0.000000e+00> : vector<16x128xf32>
    %56 = tpu.matmul %54, %55, %cst_29 {dimension_numbers = #tpu.dot_dimension_numbers<[1], [0], [0], [1], [0, 0, 1, 1], [], []>} : vector<16x64xbf16>, vector<64x128xbf16>, vector<16x128xf32> -> vector<16x128xf32>
    %c0_30 = arith.constant 0 : index
    %c0_31 = arith.constant 0 : index
    %57 = vector.load %arg12[%c0_30, %c0_31] : memref<1x128xf32, #tpu.memory_space<vmem>>, vector<1x128xf32>
    %58 = vector.broadcast %57 : vector<1x128xf32> to vector<16x128xf32>
    %59 = arith.addf %56, %58 : vector<16x128xf32>
    %c0_32 = arith.constant 0 : index
    %c0_33 = arith.constant 0 : index
    %60 = vector.load %arg13[%c0_32, %c0_33] : memref<16x128xf32, #tpu.memory_space<vmem>>, vector<16x128xf32>
    tpu.vector_store %arg13[%c0_32, %c0_33], %59 {strides = array<i32>} : memref<16x128xf32, #tpu.memory_space<vmem>>, vector<16x128xf32>,
    return
  }
  func.func @transform_0(%arg0: i32) -> (i32, i32) {
    %c0_i32 = arith.constant 0 : i32
    %c0_i32_0 = arith.constant 0 : i32
    return %arg0, %c0_i32 : i32, i32
  }
  func.func @transform_1(%arg0: i32) -> (i32, i32) {
    %c0_i32 = arith.constant 0 : i32
    %c0_i32_0 = arith.constant 0 : i32
    %c0_i32_1 = arith.constant 0 : i32
    return %c0_i32, %c0_i32_0 : i32, i32
  }
  func.func @transform_2(%arg0: i32) -> (i32, i32) {
    %c0_i32 = arith.constant 0 : i32
    %c0_i32_0 = arith.constant 0 : i32
    %c0_i32_1 = arith.constant 0 : i32
    return %c0_i32, %c0_i32_0 : i32, i32
  }
  func.func @transform_3(%arg0: i32) -> (i32, i32) {
    %c0_i32 = arith.constant 0 : i32
    %c0_i32_0 = arith.constant 0 : i32
    %c0_i32_1 = arith.constant 0 : i32
    return %c0_i32, %c0_i32_0 : i32, i32
  }
  func.func @transform_4(%arg0: i32) -> (i32, i32) {
    %c0_i32 = arith.constant 0 : i32
    %c0_i32_0 = arith.constant 0 : i32
    %c0_i32_1 = arith.constant 0 : i32
    return %c0_i32, %c0_i32_0 : i32, i32
  }
  func.func @transform_5(%arg0: i32) -> (i32, i32) {
    %c0_i32 = arith.constant 0 : i32
    %c0_i32_0 = arith.constant 0 : i32
    %c0_i32_1 = arith.constant 0 : i32
    return %c0_i32, %c0_i32_0 : i32, i32
  }
  func.func @transform_6(%arg0: i32) -> (i32, i32) {
    %c0_i32 = arith.constant 0 : i32
    %c0_i32_0 = arith.constant 0 : i32
    %c0_i32_1 = arith.constant 0 : i32
    return %c0_i32, %c0_i32_0 : i32, i32
  }
  func.func @transform_7(%arg0: i32) -> (i32, i32) {
    %c0_i32 = arith.constant 0 : i32
    %c0_i32_0 = arith.constant 0 : i32
    %c0_i32_1 = arith.constant 0 : i32
    return %c0_i32, %c0_i32_0 : i32, i32
  }
  func.func @transform_8(%arg0: i32) -> (i32, i32, i32) {
    %c0_i32 = arith.constant 0 : i32
    %c0_i32_0 = arith.constant 0 : i32
    %c0_i32_1 = arith.constant 0 : i32
    %c0_i32_2 = arith.constant 0 : i32
    return %c0_i32, %c0_i32_0, %c0_i32_1 : i32, i32, i32
  }
  func.func @transform_9(%arg0: i32) -> (i32, i32) {
    %c0_i32 = arith.constant 0 : i32
    %c0_i32_0 = arith.constant 0 : i32
    %c0_i32_1 = arith.constant 0 : i32
    return %c0_i32, %c0_i32_0 : i32, i32
  }
  func.func @transform_10(%arg0: i32) -> (i32, i32) {
    %c0_i32 = arith.constant 0 : i32
    %c0_i32_0 = arith.constant 0 : i32
    %c0_i32_1 = arith.constant 0 : i32
    return %c0_i32, %c0_i32_0 : i32, i32
  }
  func.func @transform_11(%arg0: i32) -> (i32, i32) {
    %c0_i32 = arith.constant 0 : i32
    %c0_i32_0 = arith.constant 0 : i32
    %c0_i32_1 = arith.constant 0 : i32
    return %c0_i32, %c0_i32_0 : i32, i32
  }
  func.func @transform_12(%arg0: i32) -> (i32, i32) {
    %c0_i32 = arith.constant 0 : i32
    %c0_i32_0 = arith.constant 0 : i32
    return %arg0, %c0_i32 : i32, i32
  }
}

</mosaic_0001>

<bundles_post_ra>
// kernel: tpu_custom_call.1
= control target key start
LH: loop header
LB: loop body
LE: loop exit
PB: predicated region body
PF: predicated region fallthrough
CT: control target
= control target key end

     0   :  { %s1099_s25 = smov 21   ;;  %vm159_vm0 = vcmask 1044480   ;;  %s1347_s0 = inlined_call_operand.vmem [shape: bf16[112,21], index: 0, kind: input, shape index: {}]   ;;  %s1348_s1 = inlined_call_operand.vmem [shape: bf16[42,48], index: 1, kind: input, shape index: {}]   ;;  %s1349_s2 = inlined_call_operand.vmem [shape: bf16[42,48], index: 2, kind: input, shape index: {}]   ;;  %s1350_s3 = inlined_call_operand.vmem [shape: f32[1,48], index: 3, kind: input, shape index: {}]   ;;  %s1351_s4 = inlined_call_operand.vmem [shape: bf16[96,64], index: 4, kind: input, shape index: {}]   ;;  %s1352_s5 = inlined_call_operand.vmem [shape: f32[1,64], index: 5, kind: input, shape index: {}]   ;;  %s1353_s6 = inlined_call_operand.vmem [shape: bf16[128,64], index: 6, kind: input, shape index: {}]   ;;  %s1354_s7 = inlined_call_operand.vmem [shape: f32[1,64], index: 7, kind: input, shape index: {}]   ;;  %s1355_s8 = inlined_call_operand.vmem [shape: bf16[1,64,64], index: 8, kind: input, shape index: {}]   ;;  %s1356_s9 = inlined_call_operand.vmem [shape: f32[1,64], index: 9, kind: input, shape index: {}]   ;;  %s1357_s10 = inlined_call_operand.vmem [shape: bf16[64,128], index: 10, kind: input, shape index: {}]   ;;  %s1358_s11 = inlined_call_operand.vmem [shape: f32[1,128], index: 11, kind: input, shape index: {}]   ;;  %s1359_s12 = inlined_call_operand.hbm [shape: f32[16,128], index: 12, kind: output, shape index: {}]  }
   0x1   :  { %v1036_v0 = vld [vmem:[%s1347_s0 + $0x8] sm:$0xff]   ;;  %v1037_v1 = vld [vmem:[%s1347_s0 + $0x10] sm:$0xff]   ;;  %v1038_v2 = vld [vmem:[%s1347_s0 + $0x18] sm:$0xff]  }
   0x2   :  { %92 = vrot.lane.b32.xlu0 %v1036_v0, %s1099_s25  ;;  %96 = vrot.lane.b32.xlu1 %v1038_v2, %s1099_s25  ;;  %v1039_v3 = vld [vmem:[%s1347_s0 + $0x20] sm:$0xff]   ;;  %v1040_v4 = vld [vmem:[%s1347_s0 + $0x28] sm:$0xff]  }
   0x3   :  { %v1041_v5 = vld [vmem:[%s1347_s0 + $0x30] sm:$0xff]   ;;  %v1042_v6 = vld [vmem:[%s1348_s1] sm:$0xff]   ;;  %v1044_v8 = vld [vmem:[%s1348_s1 + $0x8] sm:$0xff]  }
   0x4   :  { %v1043_v7 = vld [vmem:[%s1349_s2] sm:$0xff]   ;;  %930 = vmatprep.subr.bf16.mxu0 %v1042_v6  ;;  %v1045_v9 = vld [vmem:[%s1349_s2 + $0x8] sm:$0xff]   ;;  %v1046_v10 = vld [vmem:[%s1348_s1 + $0x10] sm:$0x1f]  }
   0x5   :  { %948 = vmatprep.subr.bf16.mxu1 %v1043_v7  ;;  %931 = vmatpush3.bf16.msra.mxu0 %v1042_v6  ;;  %v1048_v11 = vld [vmem:[%s1349_s2 + $0x10] sm:$0x1f]   ;;  %v161_v12 = vsel %vm159_vm0, %v1046_v10, 0 }
   0x6   :  { %94 = vrot.lane.b32.xlu0 %v1037_v1, %s1099_s25  ;;  %98 = vrot.lane.b32.xlu1 %v1039_v3, %s1099_s25  ;;  %v268_v13 = vsel %vm159_vm0, %v1048_v11, 0 }
   0x7   :  { %949 = vmatpush3.bf16.msra.mxu1 %v1043_v7  ;;  %932 = vmatprep.subr.bf16.mxu0 %v1044_v8 }
   0x8   :  { %950 = vmatprep.subr.bf16.mxu1 %v1045_v9 }
   0x9   :  { %933 = vmatpush3.bf16.msra.mxu0 %v1044_v8 }
   0xa   :  { %100 = vrot.lane.b32.xlu0 %v1040_v4, %s1099_s25  ;;  %102 = vrot.lane.b32.xlu1 %v1041_v5, %s1099_s25 }
   0xb   :  { %951 = vmatpush3.bf16.msra.mxu1 %v1045_v9  ;;  %1026 = vmatprep.subr.msk.bf16.mxu0 %vm159_vm0, %v1046_v10 }
   0xc   :  { %1027 = vmatprep.subr.msk.bf16.mxu1 %vm159_vm0, %v1048_v11 }
   0xd   :  { %935 = vmatpush3.bf16.msra.mxu0 %v161_v12 }
   0xf   :  { %953 = vmatpush3.bf16.msra.mxu1 %v268_v13 }
  0x10   :  { %17 = vsyncpa [#allocation3], 0  ;;  %v1047_v14 = vld [vmem:[%s1347_s0] sm:$0xff]   ;;  %vm104_vm1 = vcmask 171008   ;;  %vm146_vm2 = vcmask 343040   ;;  %v1050_v28 = vld [vmem:[%s1351_s4 + $0x8] sm:$0xff]  }
  0x11   :  { %v1049_v27 = vld [vmem:[%s1351_s4] sm:$0xff]   ;;  %v1051_v29 = vld [vmem:[%s1351_s4 + $0x10] sm:$0xff]   ;;  %v1052_v30 = vld [vmem:[%s1351_s4 + $0x18] sm:$0xff]   ;;  %vm397_vm3 = vcmask 392192   ;;  %vm459_vm4 = vcmask 785408   ;;  %vm1102_vm5 = vmmov 0  }
  0x12   :  { %966 = vmatprep.subr.bf16.mxu0 %v1049_v27  ;;  %v854_v39 = vld [vmem:[%s1350_s3] ss:$0 sm:$0xff]  ;;  %v1054_v59 = vld [vmem:[%s1351_s4 + $0x28] sm:$0xff]   ;;  %vm522_vm6 = vcmask 523264   ;;  %s1104_s14 = smov [#allocation2]  }
  0x13   :  { %v1053_v50 = vld [vmem:[%s1351_s4 + $0x20] sm:$0xff]   ;;  %s1100_s4 = smov 48   ;;  %s818_s15 = sshll.u32 %s1104_s14, 4  ;;  %s819_s15 = int_to_ptr.vmem [resolvable:$true] %s818_s15 }
  0x14   :  { %p1080_p1 = scmp.lt.s32.totalorder %s819_s15, %s819_s15 }
  0x74   :  { %v93_v15 = vpop.permute.xlu0 %92  ;;  %v97_v17 = vpop.permute.xlu1 %96 }
  0x75   :  { %v107_v16 = vsel %vm104_vm1, %v1047_v14, %v93_v15  ;;  %v113_v19 = vsel %vm104_vm1, %v1037_v1, %v97_v17 }
  0x76   :  { %936 = vmatprep.mubr.msk.bf16.mxu0 %vm146_vm2, %v107_v16  ;;  %954 = vmatprep.mubr.msk.bf16.mxu1 %vm146_vm2, %v107_v16 }
  0x78   :  { %v95_v18 = vpop.permute.xlu0 %94  ;;  %v99_v21 = vpop.permute.xlu1 %98 }
  0x79   :  { %v110_v20 = vsel %vm104_vm1, %v1036_v0, %v95_v18  ;;  %v116_v23 = vsel %vm104_vm1, %v1038_v2, %v99_v21 }
  0x7a   :  { %937 = vmatmul.mubr.msk.bf16.vlgmr.msra.gmra.mrb[0].mxu0 %vm146_vm2, %v110_v20  ;;  %955 = vmatmul.mubr.msk.bf16.vlgmr.msra.gmra.mrb[0].mxu1 %vm146_vm2, %v110_v20 }
  0x7b   :  { %940 = vmatprep.mubr.msk.bf16.mxu0 %vm146_vm2, %v113_v19  ;;  %958 = vmatprep.mubr.msk.bf16.mxu1 %vm146_vm2, %v113_v19 }
  0x7c   :  { %v101_v22 = vpop.permute.xlu0 %100  ;;  %v103_v25 = vpop.permute.xlu1 %102  ;;  %967 = vmatpush3.bf16.msra.mxu0 %v1049_v27 }
  0x7d   :  { %v119_v24 = vsel %vm104_vm1, %v1039_v3, %v101_v22  ;;  %v122_v26 = vsel %vm104_vm1, %v1040_v4, %v103_v25  ;;  %968 = vmatprep.subr.bf16.mxu0 %v1050_v28 }
  0x80   :  { %969 = vmatpush3.bf16.msra.mxu0 %v1050_v28 }
  0x81   :  { %970 = vmatprep.subr.bf16.mxu0 %v1051_v29 }
  0x82   :  { %941 = vmatmul.mubr.msk.bf16.gmra.mrb[4].mxu0 %vm146_vm2, %v116_v23  ;;  %959 = vmatmul.mubr.msk.bf16.gmra.mrb[4].mxu1 %vm146_vm2, %v116_v23 }
  0x83   :  { %944 = vmatprep.mubr.msk.bf16.mxu0 %vm146_vm2, %v119_v24  ;;  %962 = vmatprep.mubr.msk.bf16.mxu1 %vm146_vm2, %v119_v24 }
  0x84   :  { %971 = vmatpush3.bf16.msra.mxu0 %v1051_v29 }
  0x85   :  { %972 = vmatprep.subr.bf16.mxu0 %v1052_v30 }
  0x88   :  { %973 = vmatpush3.bf16.msra.mxu0 %v1052_v30 }
  0x89   :  { %974 = vmatprep.subr.bf16.mxu0 %v1053_v50 }
  0x8a   :  { %945 = vmatmul.mubr.msk.bf16.gmra.mrb[8].mxu0 %vm146_vm2, %v122_v26  ;;  %963 = vmatmul.mubr.msk.bf16.gmra.mrb[8].mxu1 %vm146_vm2, %v122_v26 }
  0x8c   :  { %975 = vmatpush3.bf16.msra.mxu0 %v1053_v50 }
  0x8d   :  { %976 = vmatprep.subr.bf16.mxu0 %v1054_v59 }
  0x90   :  { %977 = vmatpush3.bf16.msra.mxu0 %v1054_v59  ;;  %v1065_v59 = vld [vmem:[%s1355_s8 + $0x10] sm:$0xff]  }
 0x14d   :  { %v938_v31 = vpop.f32.mrb[0].mxu0  ;;  %v956_v32 = vpop.f32.mrb[0].mxu1 }
 0x14e   :  { %v353_v33 = vmax.f32 %v938_v31, %v956_v32  ;;  %v197_v34 = vpop.f32.mrb[1].mxu0  ;;  %v304_v35 = vpop.f32.mrb[1].mxu1  ;;  %v1055_v31 = vld [vmem:[%s1353_s6] sm:$0xff]   ;;  %v1101_v32 = vmov 0.0  }
 0x14f   :  { %v351_v36 = vmax.f32 %v197_v34, %v304_v35  ;;  %v939_v37 = vpop.f32.mrb[2].mxu0  ;;  %v957_v38 = vpop.f32.mrb[2].mxu1  ;;  %982 = vmatprep.subr.bf16.mxu1 %v1101_v32  ;;  %1002 = vmatprep.subr.bf16.mxu0 %v1101_v32  ;;  %v1057_v34 = vld [vmem:[%s1353_s6 + $0x10] sm:$0xff]   ;;  %v1058_v35 = vld [vmem:[%s1353_s6 + $0x18] sm:$0xff]  }
 0x150   :  { %v354_v40 = vmax.f32 %v939_v37, %v957_v38  ;;  %v200_v41 = vpop.f32.mrb[3].mxu0  ;;  %v307_v42 = vpop.f32.mrb[3].mxu1  ;;  %983 = vmatpush3.bf16.msra.mxu1 %v1055_v31  ;;  %v1060_v37 = vld [vmem:[%s1353_s6 + $0x28] sm:$0xff]   ;;  %v1061_v38 = vld [vmem:[%s1353_s6 + $0x30] sm:$0xff]   ;;  %998 = vmatprep.mubr.msk.bf16.mxu1 %vm1102_vm5, %v1101_v32 }
 0x151   :  { %v363_v43 = vmax.f32 %v351_v36, %v353_v33  ;;  %v352_v44 = vmax.f32 %v200_v41, %v307_v42  ;;  %v1056_v33 = vld [vmem:[%s1353_s6 + $0x8] sm:$0xff]   ;;  %984 = vmatprep.subr.bf16.mxu1 %v1101_v32  ;;  %v1059_v36 = vld [vmem:[%s1353_s6 + $0x20] sm:$0xff]  }
 0x152   :  { %v855_v41 = vld [vmem:[%s1352_s5] ss:$0 sm:$0xff]  ;;  %v1064_v42 = vld [vmem:[%s1355_s8 + $0x8] sm:$0xff]   ;;  %s1103_s5 = smov 64  }
 0x153   :  { %v376_v45 = vadd.f32 %v854_v39, %v363_v43  ;;  %v364_v46 = vmax.f32 %v352_v44, %v354_v40  ;;  %v1063_v40 = vld [vmem:[%s1355_s8] sm:$0xff]  }
 0x154   :  { %985 = vmatpush3.bf16.msra.mxu1 %v1056_v33 }
 0x155   :  { %v377_v47 = vadd.f32 %v854_v39, %v364_v46  ;;  %v942_v48 = vpop.f32.mrb[4].mxu0  ;;  %v960_v49 = vpop.f32.mrb[4].mxu1  ;;  %v382_v54 = vmax.f32 %v376_v45, 0.0  ;;  %986 = vmatprep.subr.bf16.mxu1 %v1101_v32 }
 0x156   :  { %v357_v51 = vmax.f32 %v942_v48, %v960_v49  ;;  %v213_v52 = vpop.f32.mrb[5].mxu0  ;;  %v320_v53 = vpop.f32.mrb[5].mxu1 }
 0x157   :  { %v383_v55 = vmax.f32 %v377_v47, 0.0  ;;  %v355_v56 = vmax.f32 %v213_v52, %v320_v53  ;;  %v943_v57 = vpop.f32.mrb[6].mxu0  ;;  %v961_v58 = vpop.f32.mrb[6].mxu1 }
 0x158   :  { %v358_v60 = vmax.f32 %v943_v57, %v961_v58  ;;  %v216_v61 = vpop.f32.mrb[7].mxu0  ;;  %v323_v62 = vpop.f32.mrb[7].mxu1  ;;  %987 = vmatpush3.bf16.msra.mxu1 %v1057_v34 }
 0x159   :  { %v365_v63 = vmax.f32 %v355_v56, %v357_v51  ;;  %v356_v0 = vmax.f32 %v216_v61, %v323_v62  ;;  %v388_v1 = vpack.c.bf16 %v383_v55, %v382_v54  ;;  %988 = vmatprep.subr.bf16.mxu1 %v1101_v32  ;;  %v864_v61 = vld [vmem:[%s1354_s7] ss:$0 sm:$0xff] }
 0x15b   :  { %v378_v2 = vadd.f32 %v854_v39, %v365_v63  ;;  %v366_v3 = vmax.f32 %v356_v0, %v358_v60  ;;  %v1066_v60 = vld [vmem:[%s1355_s8 + $0x18] sm:$0xff]  }
 0x15c   :  { %989 = vmatpush3.bf16.msra.mxu1 %v1058_v35 }
 0x15d   :  { %v379_v4 = vadd.f32 %v854_v39, %v366_v3  ;;  %v946_v5 = vpop.f32.mrb[8].mxu0  ;;  %v964_v6 = vpop.f32.mrb[8].mxu1  ;;  %v384_v10 = vmax.f32 %v378_v2, 0.0  ;;  %990 = vmatprep.subr.bf16.mxu1 %v1101_v32 }
 0x15e   :  { %v361_v7 = vmax.f32 %v946_v5, %v964_v6  ;;  %v229_v8 = vpop.f32.mrb[9].mxu0  ;;  %v336_v9 = vpop.f32.mrb[9].mxu1 }
 0x15f   :  { %v385_v11 = vmax.f32 %v379_v4, 0.0  ;;  %v359_v12 = vmax.f32 %v229_v8, %v336_v9  ;;  %v947_v13 = vpop.f32.mrb[10].mxu0  ;;  %v965_v14 = vpop.f32.mrb[10].mxu1  ;;  %v1068_v8 = vld [vmem:[%s1357_s10 + $0x8] sm:$0xff]   ;;  %v1069_v9 = vld [vmem:[%s1357_s10 + $0x10] sm:$0xff]  }
 0x160   :  { %v362_v15 = vmax.f32 %v947_v13, %v965_v14  ;;  %v232_v16 = vpop.f32.mrb[11].mxu0  ;;  %v339_v17 = vpop.f32.mrb[11].mxu1  ;;  %991 = vmatpush3.bf16.msra.mxu1 %v1059_v36 }
 0x161   :  { %v367_v18 = vmax.f32 %v359_v12, %v361_v7  ;;  %v360_v19 = vmax.f32 %v232_v16, %v339_v17  ;;  %v389_v20 = vpack.c.bf16 %v385_v11, %v384_v10  ;;  %992 = vmatprep.subr.bf16.mxu1 %v1101_v32  ;;  %v1067_v7 = vld [vmem:[%s1357_s10] sm:$0xff]   ;;  %v1070_v10 = vld [vmem:[%s1357_s10 + $0x18] sm:$0xff]  }
 0x162   :  { %v873_v11 = vld [vmem:[%s1356_s9] ss:$0 sm:$0xff]  ;;  %s1075_s9 = scalar_lea.vmem %s819_s15, 256 }
 0x163   :  { %v380_v21 = vadd.f32 %v854_v39, %v367_v18  ;;  %v368_v22 = vmax.f32 %v360_v19, %v362_v15  ;;  %393 = vrot.lane.b32.xlu0 %v389_v20, %s1100_s4  ;;  %p1076_p0 = scmp.ne.s32.totalorder %s819_s15, %s1075_s9  ;;  %p1081_p2 = scmp.lt.s32.totalorder %s1075_s9, %s1075_s9 }
 0x164   :  { %993 = vmatpush3.bf16.msra.mxu1 %v1060_v37 }
 0x165   :  { %v381_v23 = vadd.f32 %v854_v39, %v368_v22  ;;  %v386_v24 = vmax.f32 %v380_v21, 0.0  ;;  %994 = vmatprep.subr.bf16.mxu1 %v1101_v32  ;;  %v1062_v39 = vld [vmem:[%s1353_s6 + $0x38] sm:$0xff]   ;;  %v879_v21 = vld [vmem:[%s1358_s11] ss:$0 sm:$0xff]  ;;  %p1082_p3 = por %p1081_p2, %p1080_p1 }
 0x167   :  { %v387_v25 = vmax.f32 %v381_v23, 0.0  ;;  %p1083_p4 = pnand %p1082_p3, %p1076_p0 }
 0x168   :  { %995 = vmatpush3.bf16.msra.mxu1 %v1061_v38 }
 0x169   :  { %v390_v26 = vpack.c.bf16 %v387_v25, %v386_v24  ;;  %996 = vmatprep.subr.bf16.mxu1 %v1101_v32 }
 0x16b   :  { %395 = vrot.lane.b32.xlu1 %v390_v26, %s1100_s4 }
 0x16c   :  { %997 = vmatpush3.bf16.msra.mxu1 %v1062_v39 }
 0x16d   :  { %1014 = vmatprep.subr.bf16.mxu1 %v1101_v32 }
 0x1d5   :  { %v394_v27 = vpop.permute.xlu0 %393 }
 0x1d6   :  { %v400_v28 = vsel %vm397_vm3, %v388_v1, %v394_v27 }
 0x1d7   :  { %978 = vmatprep.mubr.msk.bf16.mxu0 %vm459_vm4, %v400_v28 }
 0x1dd   :  { %v396_v29 = vpop.permute.xlu1 %395 }
 0x1de   :  { %v403_v30 = vsel %vm397_vm3, %v389_v20, %v396_v29 }
 0x1df   :  { %979 = vmatmul.mubr.msk.bf16.vlgmr.msra.gmra.mrb[12].mxu0 %vm459_vm4, %v403_v30 }
 0x1e0   :  { %1010 = vmatprep.mubr.msk.bf16.mxu0 %vm1102_vm5, %v1101_v32  ;;  %1003 = vmatpush3.bf16.msra.mxu0 %v1063_v40 }
 0x1e1   :  { %1004 = vmatprep.subr.bf16.mxu0 %v1101_v32 }
 0x1e4   :  { %1005 = vmatpush3.bf16.msra.mxu0 %v1064_v42 }
 0x1e5   :  { %1006 = vmatprep.subr.bf16.mxu0 %v1101_v32 }
 0x1e8   :  { %1007 = vmatpush3.bf16.msra.mxu0 %v1065_v59 }
 0x1e9   :  { %1008 = vmatprep.subr.bf16.mxu0 %v1101_v32 }
 0x1ec   :  { %1009 = vmatpush3.bf16.msra.mxu0 %v1066_v60 }
 0x2b2   :  { %v980_v43 = vpop.f32.mrb[12].mxu0 }
 0x2b3   :  { %v507_v44 = vadd.f32 %v980_v43, %v855_v41  ;;  %v498_v45 = vpop.f32.mrb[13].mxu0 }
 0x2b4   :  { %v499_v46 = vadd.f32 %v855_v41, %v498_v45  ;;  %v981_v47 = vpop.f32.mrb[14].mxu0 }
 0x2b5   :  { %v510_v48 = vadd.f32 %v981_v47, %v855_v41  ;;  %v501_v49 = vpop.f32.mrb[15].mxu0  ;;  %v515_v51 = vmax.f32 %v507_v44, 0.0 }
 0x2b6   :  { %v502_v50 = vadd.f32 %v855_v41, %v501_v49  ;;  %v513_v53 = vmax.f32 %v499_v46, 0.0 }
 0x2b7   :  { %v516_v52 = vmax.f32 %v510_v48, 0.0 }
 0x2b8   :  { %v514_v54 = vmax.f32 %v502_v50, 0.0 }
 0x2b9   :  { %v518_v55 = vpack.c.bf16 %v516_v52, %v515_v51 }
 0x2ba   :  { %v517_v56 = vpack.c.bf16 %v514_v54, %v513_v53 }
 0x2bb   :  { %520 = vrot.lane.b32.xlu0 %v518_v55, %s1103_s5 }
 0x32d   :  { %v521_v57 = vpop.permute.xlu0 %520 }
 0x32e   :  { %v525_v58 = vsel %vm522_vm6, %v517_v56, %v521_v57 }
 0x32f   :  { %999 = vmatmul.mubr.bf16.vlgmr.msra.gmra.mrb[12].mxu1 %v525_v58 }
 0x330   :  { %1022 = vmatprep.mubr.msk.bf16.mxu1 %vm1102_vm5, %v1101_v32  ;;  %1015 = vmatpush3.bf16.msra.mxu1 %v1067_v7 }
 0x331   :  { %1016 = vmatprep.subr.bf16.mxu1 %v1101_v32 }
 0x334   :  { %1017 = vmatpush3.bf16.msra.mxu1 %v1068_v8 }
 0x335   :  { %1018 = vmatprep.subr.bf16.mxu1 %v1101_v32 }
 0x338   :  { %1019 = vmatpush3.bf16.msra.mxu1 %v1069_v9 }
 0x339   :  { %1020 = vmatprep.subr.bf16.mxu1 %v1101_v32 }
 0x33c   :  { %1021 = vmatpush3.bf16.msra.mxu1 %v1070_v10 }
 0x402   :  { %v632_v62 = vpop.f32.mrb[12].mxu1 }
 0x403   :  { %v633_v63 = vadd.f32 %v864_v61, %v632_v62  ;;  %v1000_v0 = vpop.f32.mrb[13].mxu1 }
 0x404   :  { %v635_v1 = vpop.f32.mrb[14].mxu1 }
 0x405   :  { %v636_v2 = vadd.f32 %v864_v61, %v635_v1  ;;  %v1001_v3 = vpop.f32.mrb[15].mxu1  ;;  %v639_v4 = vmax.f32 %v633_v63, 0.0 }
 0x407   :  { %v640_v5 = vmax.f32 %v636_v2, 0.0 }
 0x409   :  { %v641_v6 = vpack.c.bf16 %v640_v5, %v639_v4 }
 0x40b   :  { %1011 = vmatmul.mubr.msk.bf16.vlgmr.msra.gmra.mrb[16].mxu0 %vm522_vm6, %v641_v6 }
 0x4de   :  { %v718_v12 = vpop.f32.mrb[16].mxu0 }
 0x4df   :  { %v719_v13 = vadd.f32 %v873_v11, %v718_v12  ;;  %v1012_v14 = vpop.f32.mrb[17].mxu0 }
 0x4e0   :  { %v721_v15 = vpop.f32.mrb[18].mxu0 }
 0x4e1   :  { %v722_v16 = vadd.f32 %v873_v11, %v721_v15  ;;  %v1013_v17 = vpop.f32.mrb[19].mxu0  ;;  %1071 = vtanh.f32 %v719_v13 }
 0x4e3   :  { %1073 = vtanh.f32 %v722_v16 }
 0x4eb   :  { %v1072_v18 = vpop.eup %1071 }
 0x4ed   :  { %v1074_v19 = vpop.eup %1073 }
 0x4ee   :  { %v727_v20 = vpack.c.bf16 %v1074_v19, %v1072_v18 }
 0x4f0   :  { %1023 = vmatmul.mubr.msk.bf16.vlgmr.msra.gmra.mrb[16].mxu1 %vm522_vm6, %v727_v20 }
 0x5c3   :  { %v804_v22 = vpop.f32.mrb[16].mxu1 }
 0x5c4   :  { %v805_v23 = vadd.f32 %v879_v21, %v804_v22  ;;  %v1024_v24 = vpop.f32.mrb[17].mxu1 }
 0x5c5   :  { %v807_v25 = vpop.f32.mrb[18].mxu1 }
 0x5c6   :  { %811 = vst [vmem:[#allocation2] sm:$0xff] %v805_v23  ;;  %v808_v26 = vadd.f32 %v879_v21, %v807_v25  ;;  %v1025_v27 = vpop.f32.mrb[19].mxu1 }
 0x5c8   :  { %812 = vst [vmem:[#allocation2 + $0x8] sm:$0xff] %v808_v26 }
 0x5c9   :  { %1086 = shalt.err (!%p1083_p4)
}
 0x5ca   :  { %s1087_s17 = scalar_lea.hbm %s1359_s12, 256 }
 0x5cb   :  { %p1088_p5 = scmp.ne.s32.totalorder %s1359_s12, %s1087_s17  ;;  %p1091_p6 = scmp.lt.u32.totalorder %s1087_s17, %s1359_s12 }
 0x5cd   :  { %p1093_p7 = pnand %p1091_p6, %p1088_p5 }
 0x5cf   :  { %1096 = shalt.err (!%p1093_p7)
}
 0x5d0   :  { %s1105_s3 = smov 128   ;;  %s1106_s5 = smov 8  }
 0x5d1   :  { %824 = dma.vmem_to_hbm [thread:$0]  %s819_s15, 256, %s1359_s12, [#allocation3], %s1105_s3, %s1105_s3, %s1106_s5  }
 0x5d2   :  { %1097 = dma.done.wait [#allocation3], 256  }
 0x5d3   :  { %1098 = vsyncadd [#allocation3], 4294967040 }
 0x5d4   :  { %828 = vsyncpa [#allocation3], 1 }

</bundles_post_ra>
